<compile_context>
chip_gen: v7x
topology: tpu7x:2x2x1
jax: 0.10.0
libtpu: 0.0.40
codegen_flags: <defaults>
</compile_context>

<pallas_src>
import functools
import math

import jax
import jax.numpy as jnp
from jax.experimental import pallas as pl
from jax.experimental.pallas import tpu as pltpu

_LANE = 128


# ---------------------------------------------------------------------------
# Coefficients (trace-time Python scalars)
# ---------------------------------------------------------------------------
def sphy_coeff(l, m):
    numerator = (2.0 * l + 1.0) * math.factorial(l - m)
    denominator = 4.0 * math.pi * math.factorial(l + m)
    return (-1.0) ** m * math.sqrt(numerator / denominator)


def build_coeffs(lmax):
    coeffs = {(0, 0): sphy_coeff(0, 0)}
    elem_count = 1
    for l in range(1, lmax + 1):
        for m in range(0, l + 1):
            coeffs[(l, m)] = sphy_coeff(l, m)
            elem_count += 1
            if m > 0:
                elem_count += 1
    return coeffs, elem_count


# ---------------------------------------------------------------------------
# Recursive LegendreP (mirrors the PyTorch helper 1:1) -- used by the reference.
# ---------------------------------------------------------------------------
def legendre_p(l, m, x):
    assert abs(m) <= l, "Error, please specify a valid combination of l and m."
    if l == 0:
        return jnp.ones_like(x)
    elif l == 1:
        if m == 1:
            return -jnp.sqrt(1.0 - x * x)
        if m == 0:
            return x
        if m == -1:
            return 0.5 * jnp.sqrt(1.0 - x * x)
    elif l == 2:
        if m == 2:
            return 3.0 * (1.0 - x * x)
        if m == 1:
            return -3.0 * x * jnp.sqrt(1.0 - x * x)
        if m == 0:
            return 0.5 * (3.0 * x * x - 1.0)
        if m == -1:
            return 0.5 * x * jnp.sqrt(1.0 - x * x)
        if m == -2:
            return 0.125 * (1.0 - x * x)
    else:
        if m < 0:
            return ((-1) ** m * math.factorial(l + m) / math.factorial(l - m)
                    * legendre_p(l, -m, x))
        if l == m:
            return -(2.0 * l - 1.0) * jnp.sqrt(1.0 - x * x) * legendre_p(l - 1, l - 1, x)
        elif l == m + 1:
            return x * (2.0 * l - 1.0) * legendre_p(l - 1, l - 1, x)
        else:
            prefac = 1.0 / float(l - m)
            return prefac * ((2.0 * l - 1.0) * x * legendre_p(l - 1, m, x)
                             - (l - 1.0 + m) * legendre_p(l - 2, m, x))


# ---------------------------------------------------------------------------
# Pallas kernel
# ---------------------------------------------------------------------------
def _isft_kernel(theta_ref, phi_ref, vals_ref, out_ref, basis_ref, *, lmax, coeffs, k_real):
    # theta/phi block: (1, 1, tN); vals block: (1, C, K_pad); out block: (1, C, tN)
    theta = theta_ref[0]          # (1, tN) -- lane-dense along N
    phi = phi_ref[0]              # (1, tN)
    vals = vals_ref[0]            # (C, K_pad)

    ct = jnp.cos(theta)                                        # cos(theta)
    st = jnp.sqrt(jnp.maximum(1.0 - ct * ct, 0.0))             # |sin(theta)|, clamped

    # cos/sin(m*phi): only 2 transcendentals, Chebyshev recurrence for m >= 2.
    cos_m = {}
    sin_m = {}
    if lmax >= 1:
        c1 = jnp.cos(phi)
        s1 = jnp.sin(phi)
        cos_m[1], sin_m[1] = c1, s1
        c_prev, s_prev = jnp.ones_like(phi), jnp.zeros_like(phi)   # m = 0
        c_cur, s_cur = c1, s1
        for m in range(2, lmax + 1):
            c_next = 2.0 * c1 * c_cur - c_prev
            s_next = 2.0 * c1 * s_cur - s_prev
            cos_m[m], sin_m[m] = c_next, s_next
            c_prev, s_prev, c_cur, s_cur = c_cur, s_cur, c_next, s_next

    # Associated Legendre P_l^m(cos theta), m >= 0, memoized recursion.
    leg = {(0, 0): jnp.ones_like(ct)}
    if lmax >= 1:
        leg[(1, 0)] = ct
        leg[(1, 1)] = -st
    if lmax >= 2:
        leg[(2, 0)] = 0.5 * (3.0 * ct * ct - 1.0)
        leg[(2, 1)] = -3.0 * ct * st
        leg[(2, 2)] = 3.0 * (1.0 - ct * ct)
    for l in range(3, lmax + 1):
        for m in range(0, l + 1):
            if m == l:
                leg[(l, m)] = -(2.0 * l - 1.0) * st * leg[(l - 1, l - 1)]
            elif m == l - 1:
                leg[(l, m)] = (2.0 * l - 1.0) * ct * leg[(l - 1, l - 1)]
            else:
                leg[(l, m)] = ((2.0 * l - 1.0) * ct * leg[(l - 1, m)]
                               - (l - 1.0 + m) * leg[(l - 2, m)]) / float(l - m)

    # Build the (K_pad, tN) basis matrix in VMEM scratch; row ordering matches the
    # PyTorch coefficient ordering in values[:, k, :].
    basis_ref[0:1, :] = coeffs[(0, 0)] * leg[(0, 0)]
    row = 1
    for l in range(1, lmax + 1):
        basis_ref[row:row + 1, :] = coeffs[(l, 0)] * leg[(l, 0)]
        row += 1
        for m in range(1, l + 1):
            factor = 2.0 * coeffs[(l, m)] * leg[(l, m)]            # (1, tN)
            basis_ref[row:row + 1, :] = factor * cos_m[m]          # real part row
            row += 1
            basis_ref[row:row + 1, :] = -(factor * sin_m[m])       # imag part row
            row += 1
    assert row == k_real
    k_pad, tn = basis_ref.shape
    if row < k_pad:  # zero the K padding rows
        basis_ref[row:k_pad, :] = jnp.zeros((k_pad - row, tn), jnp.float32)

    # (C, K_pad) @ (K_pad, tN) -> (C, tN) on the MXU, f32 accumulation.
    out_ref[0] = jnp.dot(vals, basis_ref[...], preferred_element_type=jnp.float32)


def inverse_spherical_ft(theta, phi, values, *, lmax, tile_n=512):
    """theta, phi: (B, N); values: (B, K, C), K = (lmax+1)^2. Returns (B, N, C)."""
    coeffs, elem_count = build_coeffs(lmax)
    B, N = theta.shape
    Bv, K, C = values.shape
    assert Bv == B
    assert K == elem_count, f"expected {elem_count} elements in dim=1 but got {K}"

    # Padded / transposed layouts (lane-dense N, K rounded to a sublane multiple).
    k_pad = max(8, ((K + 7) // 8) * 8)
    n_pad = ((N + _LANE - 1) // _LANE) * _LANE
    tn = min(tile_n, n_pad)
    if n_pad % tn != 0:
        tn = _LANE
    n_tiles = n_pad // tn

    theta_p = jnp.pad(theta.astype(jnp.float32), ((0, 0), (0, n_pad - N)))[:, None, :]
    phi_p = jnp.pad(phi.astype(jnp.float32), ((0, 0), (0, n_pad - N)))[:, None, :]
    vals_t = jnp.swapaxes(values.astype(jnp.float32), 1, 2)               # (B, C, K)
    vals_p = jnp.pad(vals_t, ((0, 0), (0, 0), (0, k_pad - K)))            # (B, C, K_pad)

    kernel = functools.partial(_isft_kernel, lmax=lmax, coeffs=coeffs, k_real=K)
    out_t = pl.pallas_call(
        kernel,
        out_shape=jax.ShapeDtypeStruct((B, C, n_pad), jnp.float32),
        grid=(B, n_tiles),
        in_specs=[
            pl.BlockSpec((1, 1, tn), lambda b, n: (b, 0, n)),
            pl.BlockSpec((1, 1, tn), lambda b, n: (b, 0, n)),
            # values stay resident across the N-tile axis
            pl.BlockSpec((1, C, k_pad), lambda b, n: (b, 0, 0)),
        ],
        out_specs=pl.BlockSpec((1, C, tn), lambda b, n: (b, 0, n)),
        scratch_shapes=[pltpu.VMEM((k_pad, tn), jnp.float32)],
        compiler_params=pltpu.CompilerParams(
            dimension_semantics=("parallel", "parallel")),
    )(theta_p, phi_p, vals_p)

    # (B, C, N_pad) -> (B, N, C), drop N padding.
    return jnp.swapaxes(out_t[:, :, :N], 1, 2)


# ---------------------------------------------------------------------------
# Pure-JAX reference (mirrors the PyTorch forward pass 1:1)
# ---------------------------------------------------------------------------
# TODO(synk): reference mirrors the same math as the torch module; an independent
# check against torch itself is not possible in this self-contained script.
def inverse_spherical_ft_ref(theta, phi, values, *, lmax):
    coeffs, _ = build_coeffs(lmax)
    theta = theta[:, :, None]
    phi = phi[:, :, None]
    cos_theta = jnp.cos(theta)
    cos_mphi = {m: jnp.cos(m * phi) for m in range(1, lmax + 1)}
    sin_mphi = {m: jnp.sin(m * phi) for m in range(1, lmax + 1)}
    leg = {(0, 0): legendre_p(0, 0, cos_theta)}
    for l in range(1, lmax + 1):
        for m in range(0, l + 1):
            leg[(l, m)] = legendre_p(l, m, cos_theta)
    result = values[:, 0:1, :] * coeffs[(0, 0)] * leg[(0, 0)]
    count = 1
    for l in range(1, lmax + 1):
        result = result + values[:, count:count + 1, :] * coeffs[(l, 0)] * leg[(l, 0)]
        count += 1
        for m in range(1, l + 1):
            tmp_re = values[:, count:count + 1, :] * cos_mphi[m]
            count += 1
            tmp_im = values[:, count:count + 1, :] * sin_mphi[m]
            count += 1
            result = result + coeffs[(l, m)] * leg[(l, m)] * 2.0 * (tmp_re - tmp_im)
    return result


if __name__ == "__main__":
    lmax = 3
    B, N, C = 2, 256, 8
    K = (lmax + 1) ** 2  # 16 = elem_count for lmax=3

    key = jax.random.PRNGKey(0)
    k1, k2, k3 = jax.random.split(key, 3)
    theta = jax.random.uniform(k1, (B, N), jnp.float32, 0.0, math.pi)
    phi = jax.random.uniform(k2, (B, N), jnp.float32, 0.0, 2.0 * math.pi)
    values = jax.random.normal(k3, (B, K, C), jnp.float32)

    out = inverse_spherical_ft(theta, phi, values, lmax=lmax)
    out = jax.block_until_ready(out)

    ref = inverse_spherical_ft_ref(theta, phi, values, lmax=lmax)
    assert out.shape == (B, N, C), out.shape
    max_err = float(jnp.max(jnp.abs(out - ref)))
    assert jnp.allclose(out, ref, atol=2e-4, rtol=2e-4), max_err

    print("KERNEL_OK")
</pallas_src>

<mosaic_0001>
module attributes {stable_mosaic.version = 11 : i64} {
  func.func @_isft_kernel(%arg0: i32, %arg1: i32, %arg2: memref<1x1x256xf32, #tpu.memory_space<vmem>>, %arg3: memref<1x1x256xf32, #tpu.memory_space<vmem>>, %arg4: memref<1x8x16xf32, #tpu.memory_space<vmem>>, %arg5: memref<1x8x256xf32, #tpu.memory_space<vmem>>, %arg6: memref<16x256xf32, #tpu.memory_space<vmem>>) attributes {dimension_semantics = [#tpu.dimension_semantics<parallel>, #tpu.dimension_semantics<parallel>], iteration_bounds = array<i64: 2, 1>, scalar_prefetch = 0 : i64, scratch_operands = 1 : i64, tpu.core_type = #tpu.core_type<tc>, window_params = [{transform_indices = @transform_0, window_bounds = array<i64: 1, 1, 256>}, {transform_indices = @transform_1, window_bounds = array<i64: 1, 1, 256>}, {transform_indices = @transform_2, window_bounds = array<i64: 1, 8, 16>}, {transform_indices = @transform_3, window_bounds = array<i64: 1, 8, 256>}]} {
    %c0 = arith.constant 0 : index
    %c0_0 = arith.constant 0 : index
    %c0_1 = arith.constant 0 : index
    %0 = vector.load %arg2[%c0, %c0_0, %c0_1] : memref<1x1x256xf32, #tpu.memory_space<vmem>>, vector<1x1x256xf32>
    %1 = vector.shape_cast %0 : vector<1x1x256xf32> to vector<1x256xf32>
    %c0_2 = arith.constant 0 : index
    %c0_3 = arith.constant 0 : index
    %c0_4 = arith.constant 0 : index
    %2 = vector.load %arg3[%c0_2, %c0_3, %c0_4] : memref<1x1x256xf32, #tpu.memory_space<vmem>>, vector<1x1x256xf32>
    %3 = vector.shape_cast %2 : vector<1x1x256xf32> to vector<1x256xf32>
    %c0_5 = arith.constant 0 : index
    %c0_6 = arith.constant 0 : index
    %c0_7 = arith.constant 0 : index
    %4 = vector.load %arg4[%c0_5, %c0_6, %c0_7] : memref<1x8x16xf32, #tpu.memory_space<vmem>>, vector<1x8x16xf32>
    %5 = vector.shape_cast %4 : vector<1x8x16xf32> to vector<8x16xf32>
    %6 = math.cos %1 : vector<1x256xf32>
    %7 = arith.mulf %6, %6 : vector<1x256xf32>
    %cst = arith.constant 1.000000e+00 : f32
    %8 = vector.broadcast %cst : f32 to vector<1x256xf32>
    %9 = arith.subf %8, %7 : vector<1x256xf32>
    %cst_8 = arith.constant 0.000000e+00 : f32
    %10 = vector.broadcast %cst_8 : f32 to vector<1x256xf32>
    %11 = arith.maximumf %9, %10 : vector<1x256xf32>
    %12 = math.sqrt %11 : vector<1x256xf32>
    %13 = math.cos %3 : vector<1x256xf32>
    %14 = math.sin %3 : vector<1x256xf32>
    %cst_9 = arith.constant 1.000000e+00 : f32
    %15 = vector.broadcast %cst_9 : f32 to vector<1x256xf32>
    %cst_10 = arith.constant 0.000000e+00 : f32
    %16 = vector.broadcast %cst_10 : f32 to vector<1x256xf32>
    %cst_11 = arith.constant 2.000000e+00 : f32
    %17 = vector.broadcast %cst_11 : f32 to vector<1x256xf32>
    %18 = arith.mulf %17, %13 : vector<1x256xf32>
    %19 = arith.mulf %18, %13 : vector<1x256xf32>
    %20 = arith.subf %19, %15 : vector<1x256xf32>
    %cst_12 = arith.constant 2.000000e+00 : f32
    %21 = vector.broadcast %cst_12 : f32 to vector<1x256xf32>
    %22 = arith.mulf %21, %13 : vector<1x256xf32>
    %23 = arith.mulf %22, %14 : vector<1x256xf32>
    %24 = arith.subf %23, %16 : vector<1x256xf32>
    %cst_13 = arith.constant 2.000000e+00 : f32
    %25 = vector.broadcast %cst_13 : f32 to vector<1x256xf32>
    %26 = arith.mulf %25, %13 : vector<1x256xf32>
    %27 = arith.mulf %26, %20 : vector<1x256xf32>
    %28 = arith.subf %27, %13 : vector<1x256xf32>
    %cst_14 = arith.constant 2.000000e+00 : f32
    %29 = vector.broadcast %cst_14 : f32 to vector<1x256xf32>
    %30 = arith.mulf %29, %13 : vector<1x256xf32>
    %31 = arith.mulf %30, %24 : vector<1x256xf32>
    %32 = arith.subf %31, %14 : vector<1x256xf32>
    %cst_15 = arith.constant 1.000000e+00 : f32
    %33 = vector.broadcast %cst_15 : f32 to vector<1x256xf32>
    %cst_16 = arith.constant 0.000000e+00 : f32
    %34 = vector.broadcast %cst_16 : f32 to vector<1x256xf32>
    %35 = arith.subf %34, %12 : vector<1x256xf32>
    %cst_17 = arith.constant 3.000000e+00 : f32
    %36 = vector.broadcast %cst_17 : f32 to vector<1x256xf32>
    %37 = arith.mulf %36, %6 : vector<1x256xf32>
    %38 = arith.mulf %37, %6 : vector<1x256xf32>
    %cst_18 = arith.constant 1.000000e+00 : f32
    %39 = vector.broadcast %cst_18 : f32 to vector<1x256xf32>
    %40 = arith.subf %38, %39 : vector<1x256xf32>
    %cst_19 = arith.constant 5.000000e-01 : f32
    %41 = vector.broadcast %cst_19 : f32 to vector<1x256xf32>
    %42 = arith.mulf %41, %40 : vector<1x256xf32>
    %cst_20 = arith.constant -3.000000e+00 : f32
    %43 = vector.broadcast %cst_20 : f32 to vector<1x256xf32>
    %44 = arith.mulf %43, %6 : vector<1x256xf32>
    %45 = arith.mulf %44, %12 : vector<1x256xf32>
    %46 = arith.mulf %6, %6 : vector<1x256xf32>
    %cst_21 = arith.constant 1.000000e+00 : f32
    %47 = vector.broadcast %cst_21 : f32 to vector<1x256xf32>
    %48 = arith.subf %47, %46 : vector<1x256xf32>
    %cst_22 = arith.constant 3.000000e+00 : f32
    %49 = vector.broadcast %cst_22 : f32 to vector<1x256xf32>
    %50 = arith.mulf %49, %48 : vector<1x256xf32>
    %cst_23 = arith.constant 5.000000e+00 : f32
    %51 = vector.broadcast %cst_23 : f32 to vector<1x256xf32>
    %52 = arith.mulf %51, %6 : vector<1x256xf32>
    %53 = arith.mulf %52, %42 : vector<1x256xf32>
    %cst_24 = arith.constant 2.000000e+00 : f32
    %54 = vector.broadcast %cst_24 : f32 to vector<1x256xf32>
    %55 = arith.mulf %54, %6 : vector<1x256xf32>
    %56 = arith.subf %53, %55 : vector<1x256xf32>
    %cst_25 = arith.constant 3.000000e+00 : f32
    %57 = vector.broadcast %cst_25 : f32 to vector<1x256xf32>
    %58 = arith.divf %56, %57 : vector<1x256xf32>
    %cst_26 = arith.constant 5.000000e+00 : f32
    %59 = vector.broadcast %cst_26 : f32 to vector<1x256xf32>
    %60 = arith.mulf %59, %6 : vector<1x256xf32>
    %61 = arith.mulf %60, %45 : vector<1x256xf32>
    %cst_27 = arith.constant 3.000000e+00 : f32
    %62 = vector.broadcast %cst_27 : f32 to vector<1x256xf32>
    %63 = arith.mulf %62, %35 : vector<1x256xf32>
    %64 = arith.subf %61, %63 : vector<1x256xf32>
    %cst_28 = arith.constant 2.000000e+00 : f32
    %65 = vector.broadcast %cst_28 : f32 to vector<1x256xf32>
    %66 = arith.divf %64, %65 : vector<1x256xf32>
    %cst_29 = arith.constant 5.000000e+00 : f32
    %67 = vector.broadcast %cst_29 : f32 to vector<1x256xf32>
    %68 = arith.mulf %67, %6 : vector<1x256xf32>
    %69 = arith.mulf %68, %50 : vector<1x256xf32>
    %cst_30 = arith.constant -5.000000e+00 : f32
    %70 = vector.broadcast %cst_30 : f32 to vector<1x256xf32>
    %71 = arith.mulf %70, %12 : vector<1x256xf32>
    %72 = arith.mulf %71, %50 : vector<1x256xf32>
    %cst_31 = arith.constant 0.282094806 : f32
    %73 = vector.broadcast %cst_31 : f32 to vector<1x256xf32>
    %74 = arith.mulf %73, %33 : vector<1x256xf32>
    %c0_32 = arith.constant 0 : index
    %c0_33 = arith.constant 0 : index
    %75 = vector.load %arg6[%c0_32, %c0_33] : memref<16x256xf32, #tpu.memory_space<vmem>>, vector<1x256xf32>
    tpu.vector_store %arg6[%c0_32, %c0_33], %74 {strides = array<i32>} : memref<16x256xf32, #tpu.memory_space<vmem>>, vector<1x256xf32>,
    %cst_34 = arith.constant 0.488602519 : f32
    %76 = vector.broadcast %cst_34 : f32 to vector<1x256xf32>
    %77 = arith.mulf %76, %6 : vector<1x256xf32>
    %c1 = arith.constant 1 : index
    %c0_35 = arith.constant 0 : index
    %78 = vector.load %arg6[%c1, %c0_35] : memref<16x256xf32, #tpu.memory_space<vmem>>, vector<1x256xf32>
    tpu.vector_store %arg6[%c1, %c0_35], %77 {strides = array<i32>} : memref<16x256xf32, #tpu.memory_space<vmem>>, vector<1x256xf32>,
    %cst_36 = arith.constant -0.690988302 : f32
    %79 = vector.broadcast %cst_36 : f32 to vector<1x256xf32>
    %80 = arith.mulf %79, %35 : vector<1x256xf32>
    %81 = arith.mulf %80, %13 : vector<1x256xf32>
    %c2 = arith.constant 2 : index
    %c0_37 = arith.constant 0 : index
    %82 = vector.load %arg6[%c2, %c0_37] : memref<16x256xf32, #tpu.memory_space<vmem>>, vector<1x256xf32>
    tpu.vector_store %arg6[%c2, %c0_37], %81 {strides = array<i32>} : memref<16x256xf32, #tpu.memory_space<vmem>>, vector<1x256xf32>,
    %83 = arith.mulf %80, %14 : vector<1x256xf32>
    %cst_38 = arith.constant 0.000000e+00 : f32
    %84 = vector.broadcast %cst_38 : f32 to vector<1x256xf32>
    %85 = arith.subf %84, %83 : vector<1x256xf32>
    %c3 = arith.constant 3 : index
    %c0_39 = arith.constant 0 : index
    %86 = vector.load %arg6[%c3, %c0_39] : memref<16x256xf32, #tpu.memory_space<vmem>>, vector<1x256xf32>
    tpu.vector_store %arg6[%c3, %c0_39], %85 {strides = array<i32>} : memref<16x256xf32, #tpu.memory_space<vmem>>, vector<1x256xf32>,
    %cst_40 = arith.constant 0.63078314 : f32
    %87 = vector.broadcast %cst_40 : f32 to vector<1x256xf32>
    %88 = arith.mulf %87, %42 : vector<1x256xf32>
    %c4 = arith.constant 4 : index
    %c0_41 = arith.constant 0 : index
    %89 = vector.load %arg6[%c4, %c0_41] : memref<16x256xf32, #tpu.memory_space<vmem>>, vector<1x256xf32>
    tpu.vector_store %arg6[%c4, %c0_41], %88 {strides = array<i32>} : memref<16x256xf32, #tpu.memory_space<vmem>>, vector<1x256xf32>,
    %cst_42 = arith.constant -0.515032291 : f32
    %90 = vector.broadcast %cst_42 : f32 to vector<1x256xf32>
    %91 = arith.mulf %90, %45 : vector<1x256xf32>
    %92 = arith.mulf %91, %13 : vector<1x256xf32>
    %c5 = arith.constant 5 : index
    %c0_43 = arith.constant 0 : index
    %93 = vector.load %arg6[%c5, %c0_43] : memref<16x256xf32, #tpu.memory_space<vmem>>, vector<1x256xf32>
    tpu.vector_store %arg6[%c5, %c0_43], %92 {strides = array<i32>} : memref<16x256xf32, #tpu.memory_space<vmem>>, vector<1x256xf32>,
    %94 = arith.mulf %91, %14 : vector<1x256xf32>
    %cst_44 = arith.constant 0.000000e+00 : f32
    %95 = vector.broadcast %cst_44 : f32 to vector<1x256xf32>
    %96 = arith.subf %95, %94 : vector<1x256xf32>
    %c6 = arith.constant 6 : index
    %c0_45 = arith.constant 0 : index
    %97 = vector.load %arg6[%c6, %c0_45] : memref<16x256xf32, #tpu.memory_space<vmem>>, vector<1x256xf32>
    tpu.vector_store %arg6[%c6, %c0_45], %96 {strides = array<i32>} : memref<16x256xf32, #tpu.memory_space<vmem>>, vector<1x256xf32>,
    %cst_46 = arith.constant 0.257516146 : f32
    %98 = vector.broadcast %cst_46 : f32 to vector<1x256xf32>
    %99 = arith.mulf %98, %50 : vector<1x256xf32>
    %100 = arith.mulf %99, %20 : vector<1x256xf32>
    %c7 = arith.constant 7 : index
    %c0_47 = arith.constant 0 : index
    %101 = vector.load %arg6[%c7, %c0_47] : memref<16x256xf32, #tpu.memory_space<vmem>>, vector<1x256xf32>
    tpu.vector_store %arg6[%c7, %c0_47], %100 {strides = array<i32>} : memref<16x256xf32, #tpu.memory_space<vmem>>, vector<1x256xf32>,
    %102 = arith.mulf %99, %24 : vector<1x256xf32>
    %cst_48 = arith.constant 0.000000e+00 : f32
    %103 = vector.broadcast %cst_48 : f32 to vector<1x256xf32>
    %104 = arith.subf %103, %102 : vector<1x256xf32>
    %c8 = arith.constant 8 : index
    %c0_49 = arith.constant 0 : index
    %105 = vector.load %arg6[%c8, %c0_49] : memref<16x256xf32, #tpu.memory_space<vmem>>, vector<1x256xf32>
    tpu.vector_store %arg6[%c8, %c0_49], %104 {strides = array<i32>} : memref<16x256xf32, #tpu.memory_space<vmem>>, vector<1x256xf32>,
    %cst_50 = arith.constant 0.746352672 : f32
    %106 = vector.broadcast %cst_50 : f32 to vector<1x256xf32>
    %107 = arith.mulf %106, %58 : vector<1x256xf32>
    %c9 = arith.constant 9 : index
    %c0_51 = arith.constant 0 : index
    %108 = vector.load %arg6[%c9, %c0_51] : memref<16x256xf32, #tpu.memory_space<vmem>>, vector<1x256xf32>
    tpu.vector_store %arg6[%c9, %c0_51], %107 {strides = array<i32>} : memref<16x256xf32, #tpu.memory_space<vmem>>, vector<1x256xf32>,
    %cst_52 = arith.constant -0.430906922 : f32
    %109 = vector.broadcast %cst_52 : f32 to vector<1x256xf32>
    %110 = arith.mulf %109, %66 : vector<1x256xf32>
    %111 = arith.mulf %110, %13 : vector<1x256xf32>
    %c10 = arith.constant 10 : index
    %c0_53 = arith.constant 0 : index
    %112 = vector.load %arg6[%c10, %c0_53] : memref<16x256xf32, #tpu.memory_space<vmem>>, vector<1x256xf32>
    tpu.vector_store %arg6[%c10, %c0_53], %111 {strides = array<i32>} : memref<16x256xf32, #tpu.memory_space<vmem>>, vector<1x256xf32>,
    %113 = arith.mulf %110, %14 : vector<1x256xf32>
    %cst_54 = arith.constant 0.000000e+00 : f32
    %114 = vector.broadcast %cst_54 : f32 to vector<1x256xf32>
    %115 = arith.subf %114, %113 : vector<1x256xf32>
    %c11 = arith.constant 11 : index
    %c0_55 = arith.constant 0 : index
    %116 = vector.load %arg6[%c11, %c0_55] : memref<16x256xf32, #tpu.memory_space<vmem>>, vector<1x256xf32>
    tpu.vector_store %arg6[%c11, %c0_55], %115 {strides = array<i32>} : memref<16x256xf32, #tpu.memory_space<vmem>>, vector<1x256xf32>,
    %cst_56 = arith.constant 0.136264727 : f32
    %117 = vector.broadcast %cst_56 : f32 to vector<1x256xf32>
    %118 = arith.mulf %117, %69 : vector<1x256xf32>
    %119 = arith.mulf %118, %20 : vector<1x256xf32>
    %c12 = arith.constant 12 : index
    %c0_57 = arith.constant 0 : index
    %120 = vector.load %arg6[%c12, %c0_57] : memref<16x256xf32, #tpu.memory_space<vmem>>, vector<1x256xf32>
    tpu.vector_store %arg6[%c12, %c0_57], %119 {strides = array<i32>} : memref<16x256xf32, #tpu.memory_space<vmem>>, vector<1x256xf32>,
    %121 = arith.mulf %118, %24 : vector<1x256xf32>
    %cst_58 = arith.constant 0.000000e+00 : f32
    %122 = vector.broadcast %cst_58 : f32 to vector<1x256xf32>
    %123 = arith.subf %122, %121 : vector<1x256xf32>
    %c13 = arith.constant 13 : index
    %c0_59 = arith.constant 0 : index
    %124 = vector.load %arg6[%c13, %c0_59] : memref<16x256xf32, #tpu.memory_space<vmem>>, vector<1x256xf32>
    tpu.vector_store %arg6[%c13, %c0_59], %123 {strides = array<i32>} : memref<16x256xf32, #tpu.memory_space<vmem>>, vector<1x256xf32>,
    %cst_60 = arith.constant -0.055629842 : f32
    %125 = vector.broadcast %cst_60 : f32 to vector<1x256xf32>
    %126 = arith.mulf %125, %72 : vector<1x256xf32>
    %127 = arith.mulf %126, %28 : vector<1x256xf32>
    %c14 = arith.constant 14 : index
    %c0_61 = arith.constant 0 : index
    %128 = vector.load %arg6[%c14, %c0_61] : memref<16x256xf32, #tpu.memory_space<vmem>>, vector<1x256xf32>
    tpu.vector_store %arg6[%c14, %c0_61], %127 {strides = array<i32>} : memref<16x256xf32, #tpu.memory_space<vmem>>, vector<1x256xf32>,
    %129 = arith.mulf %126, %32 : vector<1x256xf32>
    %cst_62 = arith.constant 0.000000e+00 : f32
    %130 = vector.broadcast %cst_62 : f32 to vector<1x256xf32>
    %131 = arith.subf %130, %129 : vector<1x256xf32>
    %c15 = arith.constant 15 : index
    %c0_63 = arith.constant 0 : index
    %132 = vector.load %arg6[%c15, %c0_63] : memref<16x256xf32, #tpu.memory_space<vmem>>, vector<1x256xf32>
    tpu.vector_store %arg6[%c15, %c0_63], %131 {strides = array<i32>} : memref<16x256xf32, #tpu.memory_space<vmem>>, vector<1x256xf32>,
    %c0_64 = arith.constant 0 : index
    %c0_65 = arith.constant 0 : index
    %133 = vector.load %arg6[%c0_64, %c0_65] : memref<16x256xf32, #tpu.memory_space<vmem>>, vector<16x256xf32>
    %cst_66 = arith.constant dense<0.000000e+00> : vector<8x256xf32>
    %134 = tpu.matmul %5, %133, %cst_66 {dimension_numbers = #tpu.dot_dimension_numbers<[1], [0], [0], [1], [0, 0, 1, 1], [], []>} : vector<8x16xf32>, vector<16x256xf32>, vector<8x256xf32> -> vector<8x256xf32>
    %c0_67 = arith.constant 0 : index
    %c0_68 = arith.constant 0 : index
    %c0_69 = arith.constant 0 : index
    %135 = vector.load %arg5[%c0_67, %c0_68, %c0_69] : memref<1x8x256xf32, #tpu.memory_space<vmem>>, vector<1x8x256xf32>
    %136 = vector.shape_cast %135 : vector<1x8x256xf32> to vector<8x256xf32>
    %137 = vector.shape_cast %134 : vector<8x256xf32> to vector<1x8x256xf32>
    tpu.vector_store %arg5[%c0_67, %c0_68, %c0_69], %137 {strides = array<i32>} : memref<1x8x256xf32, #tpu.memory_space<vmem>>, vector<1x8x256xf32>,
    return
  }
  func.func @transform_0(%arg0: i32, %arg1: i32) -> (i32, i32, i32) {
    %c0_i32 = arith.constant 0 : i32
    %c0_i32_0 = arith.constant 0 : i32
    return %arg0, %c0_i32, %arg1 : i32, i32, i32
  }
  func.func @transform_1(%arg0: i32, %arg1: i32) -> (i32, i32, i32) {
    %c0_i32 = arith.constant 0 : i32
    %c0_i32_0 = arith.constant 0 : i32
    return %arg0, %c0_i32, %arg1 : i32, i32, i32
  }
  func.func @transform_2(%arg0: i32, %arg1: i32) -> (i32, i32, i32) {
    %c0_i32 = arith.constant 0 : i32
    %c0_i32_0 = arith.constant 0 : i32
    %c0_i32_1 = arith.constant 0 : i32
    return %arg0, %c0_i32, %c0_i32_0 : i32, i32, i32
  }
  func.func @transform_3(%arg0: i32, %arg1: i32) -> (i32, i32, i32) {
    %c0_i32 = arith.constant 0 : i32
    %c0_i32_0 = arith.constant 0 : i32
    return %arg0, %c0_i32, %arg1 : i32, i32, i32
  }
}

</mosaic_0001>

<bundles_post_ra>
// kernel: tpu_custom_call.1
= control target key start
LH: loop header
LB: loop body
LE: loop exit
PB: predicated region body
PF: predicated region fallthrough
CT: control target
= control target key end

     0   :  { %s1674_s0 = inlined_call_operand.hbm [shape: f32[2,1,256], index: 0, kind: input, shape index: {}]   ;;  %s1675_s1 = inlined_call_operand.hbm [shape: f32[2,1,256], index: 1, kind: input, shape index: {}]   ;;  %s1676_s2 = inlined_call_operand.hbm [shape: f32[2,8,16], index: 2, kind: input, shape index: {}]   ;;  %s1677_s3 = inlined_call_operand.hbm [shape: f32[2,8,256], index: 3, kind: output, shape index: {}]  }
   0x1   :  { %1684 = sst [smem:[#allocation16_spill]] %s1674_s0 }
   0x2   :  { %1685 = sst [smem:[#allocation17_spill]] %s1675_s1 }
   0x3   :  { %8 = vsyncpa [#allocation4], 0 }
   0x4   :  { %10 = vsyncpa [#allocation4 + $0x1], 0 }
   0x5   :  { %11 = vsyncpa [#allocation7], 0 }
   0x6   :  { %13 = vsyncpa [#allocation7 + $0x1], 0 }
   0x7   :  { %14 = vsyncpa [#allocation5], 0 }
   0x8   :  { %16 = vsyncpa [#allocation5 + $0x1], 0  ;;  %s1295_s12 = smov 0   ;;  %s1297_s13 = smov 0  }
   0x9   :  { %s1299_s14 = smov 0   ;;  %s1301_s15 = smov 0  }
   0xa   :  { %s1303_s16 = smov 0   ;;  %s1305_s17 = smov 0  }
   0xb LB: > { %1686 = sst [smem:[#allocation13_spill]] %s1249_s14  ;;  %s1326_s18 = sadd.s32 4294967295, %s1261_s17   ;;  %s1261_s17 = sphi %s1305_s17, %s22_s17   ;;  %s1257_s16 = sphi %s1303_s16, %s1718_s16   ;;  %s1253_s15 = sphi %s1301_s15, %s1717_s15   ;;  %s1249_s14 = sphi %s1299_s14, %s1713_s14   ;;  %s1245_s13 = sphi %s1297_s13, %s1716_s13   ;;  %s1241_s12 = sphi %s1295_s12, %s1715_s12  }
   0xc   : > { %s944_s19 = sadd.s32 4294967294, %s1261_s17   ;;  %s34_s20 = sadd.s32 1, %s1257_s16 }
   0xd   : > { %s43_s21 = sadd.s32 1, %s1249_s14  ;;  %p36_p0 = scmp.ge.s32.totalorder %s34_s20, 2 }
   0xe   : > { %p50_p1 = scmp.ne.s32.totalorder %s1249_s14, %s1245_s13  ;;  %p51_p2 = scmp.eq.s32.totalorder %s1261_s17, 0 }
   0xf   : > { %p56_p3 = scmp.ne.s32.totalorder %s1245_s13, %s1241_s12  ;;  %s1720_s20 = smov (%p36_p0, %s34_s20), 0 }
  0x10   : > { %1687 = sst [smem:[#allocation14_spill]] %s1720_s20  ;;  %p1338_p4 = por %p51_p2, %p50_p1 }
  0x11   : > { %p57_p5 = scmp.eq.s32.totalorder %s1326_s18, 0  ;;  %s38_s23 = ssub.s32 %s1257_s16, %s1720_s20 }
  0x12   : > { %p136_p6 = scmp.eq.s32.totalorder %s1326_s18, 1  ;;  %p41_p7 = scmp.eq.s32.totalorder %s38_s23, 0 }
  0x13   : > { %p1346_p8 = por %p57_p5, %p56_p3  ;;  %p142_p10 = scmp.eq.s32.totalorder %s944_s19, 1 }
  0x14   : > { %p1350_p9 = por %p136_p6, %p50_p1  ;;  %p1017_p13 = scmp.lt.s32.totalorder %s1261_s17, 2 }
  0x15   : > { %s1689_s24 = scalar_select %p1346_p8, 1, 0 }
  0x16   : > { %s1690_s25 = scalar_select %p1350_p9, 1, 0 }
  0x17   : > { %s1355_s26 = scalar_select %p41_p7, %s1249_s14, %s43_s21  }
  0x18   : > { %p1357_p11 = por %p142_p10, %p56_p3  ;;  %s1364_s28 = sand.u32 1, %s1249_s14  }
  0x19   : > { %1691 = sst [smem:[#allocation15_spill]] %s1355_s26  ;;  %s947_s29 = sshll.u32 %s1364_s28, 1 }
  0x1a   : > { %s1692_s27 = scalar_select %p1357_p11, 1, 0 }
  0x1b   : > { %s980_s30 = sshll.u32 %s1257_s16, 5  ;;  %p1370_p0 = pnand %p1017_p13, %p1338_p4 }
  0x1c   : > { %s183_s5 = sand.u32 1, %s1261_s17   ;;  %s1694_s1 = sld [smem:[#allocation17_spill]] }
  0x1d   : > { %s1693_s4 = scalar_select %p1370_p0, 1, 0 }
  0x1e   : > { %s187_s9 = scalar_lea.vmem [#allocation6], %s947_s29  ;;  %s1388_s11 = scalar_lea.sflag [#allocation7], %s183_s5 }
  0x1f   : > { %s197_s10 = sshll.u32 %s187_s9, 4  ;;  %p1394_p4 = pneg %p1370_p0  ;;  %s1385_s10 = int_to_ptr.vmem [resolvable:$true] %s197_s10 }
  0x22   : > { %s1380_s8 = scalar_lea.hbm %s1694_s1, %s980_s30  ;;  %s1090_s6 = scalar_lea.hbm %s1694_s1, 64 }
  0x23   : > { %s1085_s19 = scalar_lea.hbm %s1380_s8, 32  ;;  %p1091_p7 = scmp.lt.u32.totalorder %s1380_s8, %s1694_s1 }
  0x24   : > { %p1086_p3 = scmp.ne.s32.totalorder %s1380_s8, %s1085_s19  ;;  %p1092_p10 = scmp.lt.u32.totalorder %s1090_s6, %s1085_s19 }
  0x25   : > { %p1094_p12 = scmp.lt.u32.totalorder %s1085_s19, %s1380_s8 }
  0x26   : > { %p1088_p5 = pnand %p1394_p4, %p1086_p3  ;;  %p1093_p13 = por %p1092_p10, %p1091_p7 }
  0x28   : > { %p1089_p6 = pneg %p1088_p5  ;;  %p1095_p1 = por %p1094_p12, %p1093_p13 }
  0x2a   : > { %p1096_p2 = pnand %p1095_p1, %p1089_p6 }
  0x2c   : > { %1099 = shalt.err (!%p1096_p2)
}
  0x2d   : > { %s1100_s5 = scalar_lea.vmem %s1385_s10, 32  ;;  %s1263_s22 = smov [#allocation6]  }
  0x2e   : > { %p1101_p3 = scmp.ne.s32.totalorder %s1385_s10, %s1100_s5  ;;  %s1105_s23 = sshll.u32 %s1263_s22, 4  ;;  %s1106_s23 = int_to_ptr.vmem [resolvable:$false] %s1105_s23 }
  0x2f   : > { %s1107_s7 = scalar_lea.vmem %s1106_s23, 64  ;;  %p1108_p9 = scmp.lt.s32.totalorder %s1385_s10, %s1106_s23 }
  0x30   : > { %p1103_p5 = pnand %p1101_p3, %p1394_p4  ;;  %p1109_p8 = scmp.lt.s32.totalorder %s1107_s7, %s1100_s5 }
  0x32   : > { %p1104_p11 = pneg %p1103_p5  ;;  %p1110_p7 = por %p1109_p8, %p1108_p9 }
  0x34   : > { %p1111_p10 = pnand %p1110_p7, %p1104_p11 }
  0x36   : > { %1114 = shalt.err (!%p1111_p10)
}
  0x37   : > { %1009 = dma.hbm_to_vmem [thread:$0]  (!%p1370_p0), %s1380_s8, 32, %s1385_s10, %s1388_s11  }
  0x38   : > { %p1696_p12 = scmp.lt.s32.totalorder %s1261_s17, 3  ;;  %p1697_p1 = scmp.ge.s32.totalorder %s1261_s17, 1 }
  0x39   : > { %s1699_s0 = sld [smem:[#allocation16_spill]]  ;;  %s166_s22 = scalar_lea.vmem [#allocation3], %s947_s29 }
  0x3a   : > { %p1422_p2 = pnand %p1697_p1, %p1696_p12  ;;  %s176_s23 = sshll.u32 %s166_s22, 4  ;;  %s177_s23 = int_to_ptr.vmem [resolvable:$true] %s176_s23 }
  0x3b   : > { %s163_s10 = scalar_lea.sflag [#allocation4], %s1364_s28 }
  0x3c   : > { %s1698_s19 = scalar_select %p1422_p2, 1, 0 }
  0x3f   : > { %s1431_s5 = scalar_lea.hbm %s1699_s0, %s980_s30  ;;  %s1120_s30 = scalar_lea.hbm %s1699_s0, 64 }
  0x40   : > { %s1115_s7 = scalar_lea.hbm %s1431_s5, 32  ;;  %p1121_p6 = scmp.lt.u32.totalorder %s1431_s5, %s1699_s0 }
  0x41   : > { %p1116_p8 = scmp.ne.s32.totalorder %s1431_s5, %s1115_s7  ;;  %p1122_p13 = scmp.lt.u32.totalorder %s1120_s30, %s1115_s7 }
  0x42   : > { %p1124_p5 = scmp.lt.u32.totalorder %s1115_s7, %s1431_s5 }
  0x43   : > { %p1118_p9 = pnand %p1116_p8, %p1394_p4  ;;  %p1123_p3 = por %p1122_p13, %p1121_p6 }
  0x45   : > { %p1119_p11 = pneg %p1118_p9  ;;  %p1125_p7 = por %p1124_p5, %p1123_p3 }
  0x47   : > { %p1126_p10 = pnand %p1125_p7, %p1119_p11 }
  0x49   : > { %1129 = shalt.err (!%p1126_p10)
}
  0x4a   : > { %s1130_s29 = scalar_lea.vmem %s177_s23, 32  ;;  %s1264_s22 = smov [#allocation3]  }
  0x4b   : > { %p1131_p12 = scmp.ne.s32.totalorder %s177_s23, %s1130_s29  ;;  %s1135_s8 = sshll.u32 %s1264_s22, 4  ;;  %s1136_s8 = int_to_ptr.vmem [resolvable:$false] %s1135_s8 }
  0x4c   : > { %s1137_s1 = scalar_lea.vmem %s1136_s8, 64  ;;  %p1138_p9 = scmp.lt.s32.totalorder %s177_s23, %s1136_s8 }
  0x4d   : > { %p1133_p1 = pnand %p1131_p12, %p1394_p4  ;;  %p1139_p2 = scmp.lt.s32.totalorder %s1137_s1, %s1130_s29 }
  0x4f   : > { %p1134_p8 = pneg %p1133_p1  ;;  %p1140_p0 = por %p1139_p2, %p1138_p9 }
  0x51   : > { %p1141_p6 = pnand %p1140_p0, %p1134_p8 }
  0x53   : > { %1144 = shalt.err (!%p1141_p6)
}
  0x54   : > { %p1700_p13 = scmp.ne.s32.totalorder %s1693_s4, 0  ;;  %s954_s20 = sshll.u32 %s1257_s16, 7 }
  0x55   : > { %s1701_s7 = sshll.u32 %s1364_s28, 3  ;;  %s213_s0 = scalar_lea.hbm %s1676_s2, %s954_s20 }
  0x56   : > { %1006 = dma.hbm_to_vmem [thread:$0]  (!%p1700_p13), %s1431_s5, 32, %s177_s23, %s163_s10  }
  0x57   : > { %s208_s30 = scalar_lea.vmem [#allocation8], %s1701_s7  ;;  %s1145_s8 = scalar_lea.hbm %s213_s0, 128 }
  0x58   : > { %s215_s6 = sshll.u32 %s208_s30, 4  ;;  %p1146_p2 = scmp.ne.s32.totalorder %s213_s0, %s1145_s8  ;;  %s216_s6 = int_to_ptr.vmem [resolvable:$true] %s215_s6 }
  0x59   : > { %s1150_s26 = scalar_lea.hbm %s1676_s2, 256  ;;  %p1151_p3 = scmp.lt.u32.totalorder %s213_s0, %s1676_s2 }
  0x5a   : > { %p1148_p0 = pnand %p1146_p2, %p1394_p4  ;;  %p1152_p5 = scmp.lt.u32.totalorder %s1150_s26, %s1145_s8 }
  0x5b   : > { %p1154_p10 = scmp.lt.u32.totalorder %s1145_s8, %s213_s0 }
  0x5c   : > { %p1149_p11 = pneg %p1148_p0  ;;  %p1153_p7 = por %p1152_p5, %p1151_p3 }
  0x5e   : > { %p1155_p12 = por %p1154_p10, %p1153_p7 }
  0x60   : > { %p1156_p1 = pnand %p1155_p12, %p1149_p11 }
  0x62   : > { %1159 = shalt.err (!%p1156_p1)
}
  0x63   : > { %s1160_s28 = scalar_lea.vmem %s216_s6, 128  ;;  %s1265_s23 = smov [#allocation8]  }
  0x64   : > { %p1161_p8 = scmp.ne.s32.totalorder %s216_s6, %s1160_s28  ;;  %s1165_s10 = sshll.u32 %s1265_s23, 4  ;;  %s1166_s10 = int_to_ptr.vmem [resolvable:$false] %s1165_s10 }
  0x65   : > { %s1167_s20 = scalar_lea.vmem %s1166_s10, 256  ;;  %p1168_p2 = scmp.lt.s32.totalorder %s216_s6, %s1166_s10 }
  0x66   : > { %p1163_p9 = pnand %p1161_p8, %p1394_p4  ;;  %p1169_p0 = scmp.lt.s32.totalorder %s1167_s20, %s1160_s28 }
  0x68   : > { %p1164_p6 = pneg %p1163_p9  ;;  %p1170_p13 = por %p1169_p0, %p1168_p2 }
  0x6a   : > { %p1171_p3 = pnand %p1170_p13, %p1164_p6 }
  0x6c   : > { %1174 = shalt.err (!%p1171_p3)
}
  0x6d   : > { %p1702_p5 = scmp.ne.s32.totalorder %s1693_s4, 0  ;;  %p1703_p11 = scmp.ne.s32.totalorder %s1698_s19, 0 }
  0x6e   : > { %s1476_s14 = sand.u32 (!%p1703_p11), 1, %s1245_s13   ;;  %p1704_p4 = scmp.ne.s32.totalorder (!%p1703_p11), %s1689_s24, 0 }
  0x6f   : > { %1012 = dma.hbm_to_vmem [thread:$0]  (!%p1702_p5), %s213_s0, 128, %s216_s6, %s1388_s11  }
  0x70   : > { %224 = sbr.rel (%p1703_p11) target bundleno = 482 (0x1e2), region = 32  ;;  %s956_s26 = sshll.u32 (!%p1703_p11), %s1476_s14, 1 }
  0x71   : > { %s227_s21 = scalar_lea.sflag (!%p1703_p11), [#allocation4], %s1476_s14  ;;  %s230_s7 = scalar_lea.vmem (!%p1703_p11), [#allocation3], %s956_s26 }
  0x77   : > { %1228 = dma.done.wait (%p1704_p4), %s227_s21, 32  }
  0x78   : > { %1230 = vsyncadd (%p1704_p4), %s227_s21, 4294967264  ;;  %s235_s0 = sand.u32 1, %s1326_s18   ;;  %s239_s11 = scalar_lea.vmem [#allocation6], %s956_s26 }
  0x79   : > { %s236_s4 = scalar_lea.sflag [#allocation7], %s235_s0 }
  0x7a   : > { %1232 = dma.done.wait (%p1704_p4), %s236_s4, 160  }
  0x7b   : > { %1234 = vsyncadd (%p1704_p4), %s236_s4, 4294967136  ;;  %v637_v0 = vlaneseq  ;;  %v1266_v2 = vmov 0.2820948   ;;  %v1495_v3 = vld [vmem:[%s230_s7] sm:$0x3]  ;;  %v1267_v13 = vmov 0.0  }
  0x7c   : > { %v1497_v4 = vld [vmem:[%s239_s11] sm:$0x3]  ;;  %v287_v5 = vand.u32 2147483647, %v1495_v3  ;;  %v290_v6 = vand.u32 2139095040, %v1495_v3  ;;  %787 = vmatprep.mubr.f32.mxu0 %v1267_v13  ;;  %vm289_vm15 = vcmp.lt.s32.totalorder %v1495_v3, 0 }
  0x7d   : > { %vm1489_vm0 = vcmp.lt.s32.totalorder %v637_v0, 256  ;;  %v400_v7 = vand.u32 2147483647, %v1497_v4  ;;  %v403_v8 = vand.u32 2139095040, %v1497_v4  ;;  %v1268_v28 = vmov 683565275  }
  0x7e   : > { %641 = vst.msk [vmem:[#allocation2] ss:$8 sm:$0x3] %vm1489_vm0, %v1266_v2  ;;  %v291_v9 = vshrl.u32 %v290_v6, 23  ;;  %v294_v10 = vand.u32 8388607, %v287_v5 }
  0x7f   : > { %v404_v11 = vshrl.u32 %v403_v8, 23  ;;  %v407_v12 = vand.u32 8388607, %v400_v7  ;;  %v1269_v30 = vmov 2475754826   ;;  %s958_s18 = sshll.u32 %s1476_s14, 3 }
  0x80   : > { %v960_v14 = vadd.s32 4294967169, %v291_v9  ;;  %v295_v17 = vor.u32 8388608, %v294_v10  ;;  %v1270_v32 = vmov 2131351028   ;;  %v1271_v34 = vmov 2102212464  }
  0x81   : > { %v964_v15 = vadd.s32 4294967169, %v404_v11  ;;  %v408_v18 = vor.u32 8388608, %v407_v12  ;;  %v1272_v36 = vmov 920167782   ;;  %v1273_v44 = vmov 1326507024  }
  0x82   : > { %v297_v16 = vadd.s32 1, %v960_v14  ;;  %v1507_v24 = vshll.u32 %v295_v17, 8  ;;  %s248_s24 = scalar_lea.vmem [#allocation8], %s958_s18  ;;  %s959_s19 = sshll.u32 %s1476_s14, 4 }
  0x83   : > { %v410_v19 = vadd.s32 1, %v964_v15  ;;  %v1509_v26 = vshll.u32 %v408_v18, 8  ;;  %s280_s30 = scalar_lea.vmem [#allocation9], %s959_s19  ;;  %s982_s9 = sshll.u32 %s1253_s15, 8 }
  0x84   : > { %vm298_vm1 = vcmp.gt.s32.totalorder %v297_v16, 0  ;;  %s813_s6 = sshll.u32 %s280_s30, 4  ;;  %s1627_s29 = scalar_lea.hbm %s1677_s3, %s982_s9  ;;  %s1622_s6 = int_to_ptr.vmem [resolvable:$true] %s813_s6 }
  0x85   : > { %v299_v20 = vsel %vm298_vm1, %v297_v16, 0  ;;  %vm411_vm2 = vcmp.gt.s32.totalorder %v410_v19, 0  ;;  %vm1558_vm1 = vcmp.le.f32.partialorder %v287_v5, 0.7853982  ;;  %s797_s1 = scalar_lea.sflag [#allocation5], %s1476_s14  ;;  %s1175_s5 = scalar_lea.vmem %s1622_s6, 256 }
  0x86   : > { %v300_v21 = vshrl.u32 %v299_v20, 5  ;;  %v301_v22 = vand.u32 31, %v299_v20  ;;  %v412_v23 = vsel %vm411_vm2, %v410_v19, 0  ;;  %vm402_vm2 = vcmp.lt.s32.totalorder %v1497_v4, 0  ;;  %p1176_p13 = scmp.ne.s32.totalorder %s1622_s6, %s1175_s5  ;;  %p1709_p7 = scmp.ne.s32.totalorder %s1690_s25, 0 }
  0x87   : > { %v414_v25 = vand.u32 31, %v412_v23  ;;  %v1511_v38 = vshrl.u32 %v412_v23, 5  ;;  %s1274_s15 = smov [#allocation9]  }
  0x88   : > { %v302_v27 = vsub.s32 32, %v301_v22  ;;  %v304_v29 = vshll.u32 %v1268_v28, %v301_v22  ;;  %v307_v31 = vshll.u32 %v1269_v30, %v301_v22  ;;  %v310_v33 = vshll.u32 %v1270_v32, %v301_v22  ;;  %p1177_p10 = pnand %p1176_p13, %p1709_p7  ;;  %s1179_s28 = sshll.u32 %s1274_s15, 4  ;;  %s1180_s28 = int_to_ptr.vmem [resolvable:$false] %s1179_s28 }
  0x89   : > { %v313_v35 = vshll.u32 %v1271_v34, %v301_v22  ;;  %v316_v37 = vshll.u32 %v1272_v36, %v301_v22  ;;  %vm319_vm3 = vcmp.lt.s32.totalorder %v300_v21, 1  ;;  %vm320_vm4 = vcmp.lt.s32.totalorder %v300_v21, 2  ;;  %s1181_s23 = scalar_lea.vmem %s1180_s28, 512  ;;  %p1182_p1 = scmp.lt.s32.totalorder %s1622_s6, %s1180_s28 }
  0x8a   : > { %v303_v39 = vshrl.u32 %v1268_v28, %v302_v27  ;;  %v305_v40 = vshrl.u32 %v1269_v30, %v302_v27  ;;  %v308_v41 = vshrl.u32 %v1270_v32, %v302_v27  ;;  %v311_v42 = vshrl.u32 %v1271_v34, %v302_v27  ;;  %p1178_p12 = pneg %p1177_p10  ;;  %p1183_p8 = scmp.lt.s32.totalorder %s1181_s23, %s1175_s5 }
  0x8b   : > { %v314_v43 = vshrl.u32 %v1272_v36, %v302_v27  ;;  %v317_v45 = vshrl.u32 %v1273_v44, %v302_v27  ;;  %vm322_vm5 = vcmp.lt.s32.totalorder %v300_v21, 4  ;;  %v415_v49 = vsub.s32 32, %v414_v25 }
  0x8c   : > { %v306_v46 = vor.u32 %v305_v40, %v304_v29  ;;  %v309_v47 = vor.u32 %v308_v41, %v307_v31  ;;  %v312_v48 = vor.u32 %v311_v42, %v310_v33  ;;  %vm321_vm6 = vcmp.lt.s32.totalorder %v300_v21, 3  ;;  %p1184_p9 = por %p1183_p8, %p1182_p1 }
  0x8d   : > { %v315_v50 = vor.u32 %v314_v43, %v313_v35  ;;  %v318_v51 = vor.u32 %v317_v45, %v316_v37  ;;  %v417_v52 = vshll.u32 %v1268_v28, %v414_v25  ;;  %v420_v60 = vshll.u32 %v1269_v30, %v414_v25 }
  0x8e   : > { %v323_v53 = vsel %vm319_vm3, %v303_v39, %v306_v46  ;;  %v324_v54 = vsel %vm322_vm5, %v312_v48, 2102212464  ;;  %v327_v55 = vsel %vm319_vm3, %v306_v46, %v309_v47  ;;  %v331_v56 = vsel %vm319_vm3, %v309_v47, %v312_v48  ;;  %p1185_p6 = pnand %p1184_p9, %p1178_p12 }
  0x8f   : > { %v325_v57 = vsel %vm321_vm6, %v309_v47, %v324_v54  ;;  %v328_v58 = vsel %vm322_vm5, %v315_v50, 920167782  ;;  %v332_v59 = vsel %vm322_vm5, %v318_v51, 1326507024  ;;  %v416_v63 = vshrl.u32 %v1268_v28, %v415_v49 }
  0x90   : > { %v329_v61 = vsel %vm321_vm6, %v312_v48, %v328_v58  ;;  %v333_v62 = vsel %vm321_vm6, %v315_v50, %v332_v59  ;;  %v418_v0 = vshrl.u32 %v1269_v30, %v415_v49  ;;  %v326_v2 = vsel %vm320_vm4, %v323_v53, %v325_v57 }
  0x91   : > { %v330_v6 = vsel %vm320_vm4, %v327_v55, %v329_v61  ;;  %v334_v8 = vsel %vm320_vm4, %v331_v56, %v333_v62  ;;  %v421_v9 = vshrl.u32 %v1270_v32, %v415_v49  ;;  %v423_v16 = vshll.u32 %v1270_v32, %v414_v25 }
  0x92   : > { %v1520_v10 = vmul.u32.u64.low %v1507_v24, %v334_v8  ;;  %v1521_v11 = vmul.u32.u64.high %v1507_v24, %v334_v8, %v1520_v10  ;;  %v1524_v12 = vmul.u32.u64.low %v1507_v24, %v330_v6  ;;  %v1525_v13 = vmul.u32.u64.high %v1507_v24, %v330_v6, %v1524_v12 }
  0x93   : > { %v419_v14 = vor.u32 %v418_v0, %v417_v52  ;;  %v422_v15 = vor.u32 %v421_v9, %v420_v60  ;;  %v424_v17 = vshrl.u32 %v1271_v34, %v415_v49  ;;  %v426_v18 = vshll.u32 %v1271_v34, %v414_v25 }
  0x94   : > { %v427_v19 = vshrl.u32 %v1272_v36, %v415_v49  ;;  %v429_v20 = vshll.u32 %v1272_v36, %v414_v25  ;;  %v430_v22 = vshrl.u32 %v1273_v44, %v415_v49  ;;  %v342_v21 = vmul.u32 %v1507_v24, %v326_v2 }
  0x95   : > { %v425_v23 = vor.u32 %v424_v17, %v423_v16  ;;  %vm432_vm7 = vcmp.lt.s32.totalorder %v1511_v38, 1  ;;  %vm433_vm8 = vcmp.lt.s32.totalorder %v1511_v38, 2  ;;  %vm344_vm9 = vc.u32 %v1521_v11, %v1524_v12 }
  0x96   : > { %v345_v27 = vadd.s32 1, %v1525_v13  ;;  %v428_v28 = vor.u32 %v427_v19, %v426_v18  ;;  %vm434_vm10 = vcmp.lt.s32.totalorder %v1511_v38, 3  ;;  %v431_v29 = vor.u32 %v430_v22, %v429_v20 }
  0x97   : > { %vm435_vm11 = vcmp.lt.s32.totalorder %v1511_v38, 4  ;;  %v436_v30 = vsel %vm432_vm7, %v416_v63, %v419_v14  ;;  %v440_v25 = vsel %vm432_vm7, %v419_v14, %v422_v15  ;;  %v444_v33 = vsel %vm432_vm7, %v422_v15, %v425_v23 }
  0x98   : > { %v346_v31 = vsel %vm344_vm9, %v345_v27, %v1525_v13  ;;  %v437_v24 = vsel %vm435_vm11, %v425_v23, 2102212464  ;;  %v441_v32 = vsel %vm435_vm11, %v428_v28, 920167782  ;;  %v445_v37 = vsel %vm435_vm11, %v431_v29, 1326507024 }
  0x99   : > { %v347_v34 = vadd.s32 %v346_v31, %v342_v21  ;;  %v438_v35 = vsel %vm434_vm10, %v422_v15, %v437_v24  ;;  %v442_v36 = vsel %vm434_vm10, %v425_v23, %v441_v32  ;;  %v446_v41 = vsel %vm434_vm10, %v428_v28, %v445_v37 }
  0x9a   : > { %v439_v39 = vsel %vm433_vm8, %v436_v30, %v438_v35  ;;  %v443_v40 = vsel %vm433_vm8, %v440_v25, %v442_v36  ;;  %v447_v43 = vsel %vm433_vm8, %v444_v33, %v446_v41  ;;  %v343_v62 = vadd.s32 %v1524_v12, %v1521_v11 }
  0x9b   : > { %v348_v42 = vadd.s32 536870912, %v347_v34  ;;  %v1542_v44 = vmul.u32.u64.low %v1509_v26, %v443_v40  ;;  %v1543_v45 = vmul.u32.u64.high %v1509_v26, %v443_v40, %v1542_v44  ;;  %v455_v49 = vmul.u32 %v1509_v26, %v439_v39 }
  0x9c   : > { %v1546_v46 = vmul.u32.u64.low %v1509_v26, %v447_v43  ;;  %v1547_v47 = vmul.u32.u64.high %v1509_v26, %v447_v43, %v1546_v46  ;;  %vm401_vm3 = vcmp.le.f32.partialorder %v400_v7, 0.7853982  ;;  %vm379_vm7 = vweird.f32 %v1495_v3 }
  0x9d   : > { %v349_v48 = vshrl.u32 %v348_v42, 30  ;;  %v458_v51 = vadd.s32 1, %v1543_v45 }
  0x9e   : > { %vm457_vm12 = vc.u32 %v1547_v47, %v1542_v44  ;;  %v456_v19 = vadd.s32 %v1542_v44, %v1547_v47 }
  0x9f   : > { %v350_v50 = vshll.u32 %v349_v48, 30  ;;  %v459_v38 = vsel %vm457_vm12, %v458_v51, %v1543_v45  ;;  %v373_v25 = vsub.s32 4, %v349_v48 }
  0xa0   : > { %v460_v53 = vadd.s32 %v459_v38, %v455_v49 }
  0xa1   : > { %v351_v52 = vsub.s32 %v347_v34, %v350_v50  ;;  %v374_v36 = vsel %vm289_vm15, %v373_v25, %v349_v48 }
  0xa2   : > { %v461_v55 = vadd.s32 536870912, %v460_v53  ;;  %v376_v5 = vsel %vm1558_vm1, 0, %v374_v36 }
  0xa3   : > { %v353_v54 = vsub.s32 0, %v351_v52  ;;  %v380_v43 = vand.u32 3, %v376_v5 }
  0xa4   : > { %v462_v57 = vshrl.u32 %v461_v55, 30 }
  0xa5   : > { %v961_v56 = vmin.u32 %v353_v54, %v351_v52  ;;  %vm385_vm4 = vcmp.eq.s32.totalorder %v380_v43, 2  ;;  %vm382_vm5 = vcmp.eq.s32.totalorder %v380_v43, 0  ;;  %vm381_vm6 = vcmp.lt.s32.totalorder %v380_v43, 2 }
  0xa6   : > { %v463_v59 = vshll.u32 %v462_v57, 30  ;;  %v486_v39 = vsub.s32 4, %v462_v57 }
  0xa7   : > { %v355_v58 = vclz %v961_v56 }
  0xa8   : > { %v464_v61 = vsub.s32 %v460_v53, %v463_v59  ;;  %v487_v42 = vsel %vm402_vm2, %v486_v39, %v462_v57 }
  0xa9   : > { %v962_v60 = vadd.s32 4294967294, %v355_v58  ;;  %v489_v46 = vsel %vm401_vm3, 0, %v487_v42 }
  0xaa   : > { %v466_v63 = vsub.s32 0, %v464_v61  ;;  %v596_v50 = vadd.s32 3, %v489_v46  ;;  %v493_v53 = vand.u32 3, %v489_v46 }
  0xab   : > { %vm963_vm13 = vcmp.lt.s32.totalorder %v962_v60, 0 }
  0xac   : > { %v358_v26 = vsel %vm963_vm13, 0, %v962_v60  ;;  %v965_v8 = vmin.u32 %v466_v63, %v464_v61  ;;  %v597_v54 = vand.u32 3, %v596_v50  ;;  %vm498_vm8 = vcmp.eq.s32.totalorder %v493_v53, 2 }
  0xad   : > { %v359_v0 = vsub.s32 32, %v358_v26  ;;  %v360_v2 = vshll.u32 %v351_v52, %v358_v26  ;;  %v363_v6 = vsub.s32 4294967266, %v358_v26  ;;  %vm494_vm10 = vcmp.lt.s32.totalorder %v493_v53, 2 }
  0xae   : > { %v468_v13 = vclz %v965_v8  ;;  %vm602_vm9 = vcmp.eq.s32.totalorder %v597_v54, 2  ;;  %vm495_vm11 = vcmp.eq.s32.totalorder %v493_v53, 0  ;;  %vm599_vm12 = vcmp.eq.s32.totalorder %v597_v54, 0 }
  0xaf   : > { %v361_v9 = vshrl.u32 %v343_v62, %v359_v0  ;;  %v364_v10 = vadd.s32 127, %v363_v6  ;;  %vm598_vm13 = vcmp.lt.s32.totalorder %v597_v54, 2 }
  0xb0   : > { %v966_v16 = vadd.s32 4294967294, %v468_v13 }
  0xb1   : > { %v362_v14 = vor.u32 %v361_v9, %v360_v2  ;;  %v365_v15 = vshll.u32 %v364_v10, 23 }
  0xb2   : > { %vm967_vm14 = vcmp.lt.s32.totalorder %v966_v16, 0 }
  0xb3   : > { %v366_v17 = vor.u32 4788187, %v365_v15  ;;  %v369_v18 = vcvt.s32.f32 %v362_v14  ;;  %v471_v11 = vsel %vm967_vm14, 0, %v966_v16  ;;  %vm492_vm14 = vweird.f32 %v1497_v4 }
  0xb4   : > { %v472_v12 = vsub.s32 32, %v471_v11  ;;  %v473_v22 = vshll.u32 %v464_v61, %v471_v11  ;;  %v476_v21 = vsub.s32 4294967266, %v471_v11 }
  0xb5   : > { %v367_v20 = vand.u32 2147483647, %v366_v17 }
  0xb6   : > { %v474_v27 = vshrl.u32 %v456_v19, %v472_v12  ;;  %v477_v28 = vadd.s32 127, %v476_v21 }
  0xb7   : > { %v370_v23 = vmul.f32 %v369_v18, %v367_v20 }
  0xb8   : > { %v475_v31 = vor.u32 %v474_v27, %v473_v22  ;;  %v478_v24 = vshll.u32 %v477_v28, 23 }
  0xb9   : > { %v371_v30 = vxor.u32 2147483648, %v370_v23 }
  0xba   : > { %v479_v34 = vor.u32 4788187, %v478_v24  ;;  %v482_v35 = vcvt.s32.f32 %v475_v31 }
  0xbb   : > { %v372_v32 = vsel %vm289_vm15, %v371_v30, %v370_v23 }
  0xbc   : > { %v375_v33 = vsel %vm1558_vm1, %v1495_v3, %v372_v32  ;;  %v480_v37 = vand.u32 2147483647, %v479_v34 }
  0xbd   : > { %1075 = vcosq.f32 %v375_v33 }
  0xbe   : > { %1077 = vsinq.f32 %v375_v33  ;;  %v483_v40 = vmul.f32 %v482_v35, %v480_v37 }
  0xc0   : > { %v484_v41 = vxor.u32 2147483648, %v483_v40 }
  0xc2   : > { %v485_v44 = vsel %vm402_vm2, %v484_v41, %v483_v40  ;;  %vm719_vm2 = vcmask 130048  }
  0xc3   : > { %v488_v45 = vsel %vm401_vm3, %v1497_v4, %v485_v44 }
  0xc4   : > { %1079 = vcosq.f32 %v488_v45 }
  0xc5   : > { %1081 = vsinq.f32 %v488_v45 }
  0xc7   : > { %v1076_v47 = vpop.eup %1075 }
  0xc8   : > { %v1078_v48 = vpop.eup %1077  ;;  %v386_v49 = vxor.u32 2147483648, %v1076_v47 }
  0xc9   : > { %v383_v51 = vxor.u32 2147483648, %v1078_v48 }
  0xca   : > { %v387_v7 = vsel %vm385_vm4, %v386_v49, %v1078_v48 }
  0xcb   : > { %v384_v52 = vsel %vm382_vm5, %v1076_v47, %v383_v51 }
  0xcc   : > { %v388_v38 = vsel %vm381_vm6, %v384_v52, %v387_v7 }
  0xcd   : > { %v389_v55 = vsel %vm379_vm7, nan, %v388_v38 }
  0xce   : > { %v390_v56 = vmul.f32 %v389_v55, %v389_v55  ;;  %v616_v57 = vmul.f32 3.0, %v389_v55  ;;  %v643_v58 = vmul.f32 0.48860252, %v389_v55  ;;  %v1080_v59 = vpop.eup %1079  ;;  %v623_v9 = vmul.f32 5.0, %v389_v55 }
  0xcf   : > { %v1082_v62 = vpop.eup %1081  ;;  %v499_v26 = vxor.u32 2147483648, %v1080_v59  ;;  %v625_v10 = vmul.f32 2.0, %v389_v55  ;;  %v620_v24 = vmul.f32 -3.0, %v389_v55 }
  0xd0   : > { %v391_v60 = vsub.f32 1.0, %v390_v56  ;;  %v617_v61 = vmul.f32 %v616_v57, %v389_v55  ;;  %645 = vst.msk [vmem:[#allocation2 + $0x1] ss:$8 sm:$0x3] %vm1489_vm0, %v643_v58  ;;  %v496_v63 = vxor.u32 2147483648, %v1082_v62 }
  0xd1   : > { %v500_v6 = vsel %vm498_vm8, %v499_v26, %v1082_v62  ;;  %v604_v8 = vsel %vm602_vm9, %v499_v26, %v1082_v62 }
  0xd2   : > { %v392_v3 = vmax.f32 %v391_v60, 0.0  ;;  %v973_v0 = vadd.f32 -1.0, %v617_v61  ;;  %v622_v2 = vmul.f32 3.0, %v391_v60  ;;  %v497_v13 = vsel %vm495_vm11, %v1080_v59, %v496_v63 }
  0xd3   : > { %v601_v14 = vsel %vm599_vm12, %v1080_v59, %v496_v63  ;;  %v501_v17 = vsel %vm494_vm10, %v497_v13, %v500_v6 }
  0xd4   : > { %1083 = vrsqrt.f32 %v392_v3  ;;  %v619_v15 = vmul.f32 0.5, %v973_v0  ;;  %v634_v16 = vmul.f32 %v623_v9, %v622_v2  ;;  %v605_v18 = vsel %vm598_vm13, %v601_v14, %v604_v8 }
  0xd5   : > { %v1576_v19 = vsel %vm492_vm14, nan, %v501_v17  ;;  %v1578_v20 = vsel %vm492_vm14, nan, %v605_v18  ;;  %v671_v21 = vmul.f32 0.25751615, %v622_v2  ;;  %vm395_vm15 = vcmp.eq.f32.partialorder %v392_v3, inf }
  0xd6   : > { %v624_v11 = vmul.f32 %v623_v9, %v619_v15  ;;  %v657_v12 = vmul.f32 0.63078314, %v619_v15  ;;  %v607_v22 = vmul.f32 2.0, %v1576_v19  ;;  %v695_v23 = vmul.f32 0.13626473, %v634_v16  ;;  %v286_v15 = vld [vmem:[%s248_s24] sm:$0xff] }
  0xd7   : > { %v398_v34 = vand.u32 2147483648, %v392_v3  ;;  %vm397_vm1 = vcmp.eq.f32.partialorder %v392_v3, 0.0 }
  0xd8   : > { %v626_v27 = vsub.f32 %v624_v11, %v625_v10  ;;  %659 = vst.msk [vmem:[#allocation2 + $0x4] ss:$8 sm:$0x3] %vm1489_vm0, %v657_v12  ;;  %v608_v4 = vmul.f32 %v607_v22, %v1576_v19  ;;  %v610_v28 = vmul.f32 %v607_v22, %v1578_v20 }
  0xda   : > { %v628_v29 = vmul.f32 0.33333334, %v626_v27  ;;  %v972_v30 = vadd.f32 -1.0, %v608_v4  ;;  %v676_v25 = vmul.f32 %v671_v21, %v610_v28  ;;  %v700_v31 = vmul.f32 %v695_v23, %v610_v28 }
  0xdb   : > { %v613_v41 = vmul.f32 %v610_v28, %v607_v22 }
  0xdc   : > { %v681_v32 = vmul.f32 0.7463527, %v628_v29  ;;  %v672_v35 = vmul.f32 %v972_v30, %v671_v21  ;;  %v677_v36 = vsub.f32 0.0, %v676_v25  ;;  %v696_v39 = vmul.f32 %v972_v30, %v695_v23 }
  0xdd   : > { %v701_v5 = vsub.f32 0.0, %v700_v31  ;;  %v611_v40 = vmul.f32 %v972_v30, %v607_v22  ;;  %v614_v48 = vsub.f32 %v613_v41, %v1578_v20 }
  0xde   : > { %v1084_v33 = vpop.eup %1083  ;;  %683 = vst.msk [vmem:[#allocation2 + $0x11] ss:$8 sm:$0x3] %vm1489_vm0, %v681_v32  ;;  %674 = vst.msk [vmem:[#allocation2 + $0x7] ss:$8 sm:$0x3] %vm1489_vm0, %v672_v35 }
  0xdf   : > { %v394_v37 = vmul.f32 %v1084_v33, %v392_v3  ;;  %679 = vst.msk [vmem:[#allocation2 + $0x10] ss:$8 sm:$0x3] %vm1489_vm0, %v677_v36  ;;  %698 = vst.msk [vmem:[#allocation2 + $0x14] ss:$8 sm:$0x3] %vm1489_vm0, %v696_v39  ;;  %v612_v47 = vsub.f32 %v611_v40, %v1576_v19 }
  0xe0   : > { %703 = vst.msk [vmem:[#allocation2 + $0x15] ss:$8 sm:$0x3] %vm1489_vm0, %v701_v5 }
  0xe1   : > { %v396_v42 = vsel %vm395_vm15, %v392_v3, %v394_v37 }
  0xe2   : > { %v399_v43 = vsel %vm397_vm1, %v398_v34, %v396_v42 }
  0xe3   : > { %v615_v44 = vsub.f32 0.0, %v399_v43  ;;  %v621_v45 = vmul.f32 %v620_v24, %v399_v43  ;;  %v635_v46 = vmul.f32 -5.0, %v399_v43 }
  0xe5   : > { %v629_v49 = vmul.f32 %v623_v9, %v621_v45  ;;  %v630_v50 = vmul.f32 3.0, %v615_v44  ;;  %v636_v51 = vmul.f32 %v635_v46, %v622_v2  ;;  %v647_v7 = vmul.f32 -0.6909883, %v615_v44 }
  0xe6   : > { %v661_v52 = vmul.f32 -0.5150323, %v621_v45 }
  0xe7   : > { %v631_v38 = vsub.f32 %v629_v49, %v630_v50  ;;  %v648_v53 = vmul.f32 %v647_v7, %v1576_v19  ;;  %v652_v54 = vmul.f32 %v647_v7, %v1578_v20  ;;  %v705_v55 = vmul.f32 -0.055629842, %v636_v51 }
  0xe8   : > { %v662_v56 = vmul.f32 %v661_v52, %v1576_v19  ;;  %v666_v57 = vmul.f32 %v661_v52, %v1578_v20 }
  0xe9   : > { %v633_v58 = vmul.f32 0.5, %v631_v38  ;;  %650 = vst.msk [vmem:[#allocation2 + $0x2] ss:$8 sm:$0x3] %vm1489_vm0, %v648_v53  ;;  %v653_v59 = vsub.f32 0.0, %v652_v54  ;;  %v706_v60 = vmul.f32 %v705_v55, %v612_v47  ;;  %v710_v61 = vmul.f32 %v705_v55, %v614_v48 }
  0xea   : > { %664 = vst.msk [vmem:[#allocation2 + $0x5] ss:$8 sm:$0x3] %vm1489_vm0, %v662_v56  ;;  %v667_v62 = vsub.f32 0.0, %v666_v57 }
  0xeb   : > { %655 = vst.msk [vmem:[#allocation2 + $0x3] ss:$8 sm:$0x3] %vm1489_vm0, %v653_v59  ;;  %v685_v26 = vmul.f32 -0.43090692, %v633_v58  ;;  %v711_v3 = vsub.f32 0.0, %v710_v61 }
  0xec   : > { %708 = vst.msk [vmem:[#allocation2 + $0x16] ss:$8 sm:$0x3] %vm1489_vm0, %v706_v60  ;;  %669 = vst.msk [vmem:[#allocation2 + $0x6] ss:$8 sm:$0x3] %vm1489_vm0, %v667_v62 }
  0xed   : > { %v686_v63 = vmul.f32 %v685_v26, %v1576_v19  ;;  %v690_v0 = vmul.f32 %v685_v26, %v1578_v20  ;;  %713 = vst.msk [vmem:[#allocation2 + $0x17] ss:$8 sm:$0x3] %vm1489_vm0, %v711_v3 }
  0xef   : > { %688 = vst.msk [vmem:[#allocation2 + $0x12] ss:$8 sm:$0x3] %vm1489_vm0, %v686_v63  ;;  %v691_v2 = vsub.f32 0.0, %v690_v0 }
  0xf1   : > { %693 = vst.msk [vmem:[#allocation2 + $0x13] ss:$8 sm:$0x3] %vm1489_vm0, %v691_v2 }
  0xf3   : > { %v716_v6 = vld [vmem:[#allocation2 + $0x8] sm:$0xff]  ;;  %v715_v8 = vld [vmem:[#allocation2] sm:$0xff] }
  0xf8   : > { %v718_v9 = vld [vmem:[#allocation2 + $0x18] sm:$0xff]  ;;  %v717_v10 = vld [vmem:[#allocation2 + $0x10] sm:$0xff] }
  0xf9   : > { %v983_v13 = vpack.c.bf16 %v718_v9, %v716_v6  ;;  %v985_v14 = vpack.c.bf16 %v717_v10, %v715_v8 }
  0xfb   : > { %984 = vmatprep.subr.bf16.mxu0 %v983_v13 }
  0xfc   : > { %986 = vmatpush1.bf16.msra.mxu0 %v985_v14 }
  0xff   : > { %974 = vmatmul.mubr.msk.f32.vlgmr.msra.gmra.mrb[0].mxu0 %vm719_vm2, %v286_v15 }
 0x1d2   : > { %v789_v1 = vpop.f32.mrb[0].mxu0 }
 0x1d3   : > { %794 = vst [vmem:[%s280_s30] sm:$0xff] %v789_v1  ;;  %v791_v16 = vpop.f32.mrb[1].mxu0 }
 0x1d4   : > { %795 = vst [vmem:[%s280_s30 + $0x8] sm:$0xff] %v791_v16 }
 0x1d5   : > { %1188 = shalt.err (!%p1185_p6)
}
 0x1d6   : > { %s1189_s10 = scalar_lea.hbm %s1627_s29, 256  ;;  %s1193_s26 = scalar_lea.hbm %s1677_s3, 512 }
 0x1d7   : > { %p1190_p2 = scmp.ne.s32.totalorder %s1627_s29, %s1189_s10  ;;  %p1194_p5 = scmp.lt.u32.totalorder %s1627_s29, %s1677_s3 }
 0x1d8   : > { %p1195_p11 = scmp.lt.u32.totalorder %s1193_s26, %s1189_s10  ;;  %p1197_p13 = scmp.lt.u32.totalorder %s1189_s10, %s1627_s29 }
 0x1d9   : > { %p1191_p0 = pnand %p1190_p2, %p1709_p7 }
 0x1da   : > { %p1196_p4 = por %p1195_p11, %p1194_p5 }
 0x1db   : > { %p1192_p3 = pneg %p1191_p0 }
 0x1dc   : > { %p1198_p10 = por %p1197_p13, %p1196_p4 }
 0x1de   : > { %p1199_p12 = pnand %p1198_p10, %p1192_p3 }
 0x1e0   : > { %1202 = shalt.err (!%p1199_p12)
}
 0x1e1   : > { %1001 = dma.vmem_to_hbm [thread:$0]  (%p1709_p7), %s1622_s6, 256, %s1627_s29, %s797_s1  }
 0x1e2 PF: > { %s825_s0 = sand.u32 1, %s1241_s12   ;;  %p1710_p1 = scmp.ne.s32.totalorder %s1692_s27, 0 }
 0x1e3   : > { %p1711_p8 = scmp.ge.s32.totalorder %s1261_s17, 2  ;;  %s826_s4 = scalar_lea.sflag [#allocation5], %s825_s0 }
 0x1e5   : > { %p1014_p9 = pnand %p1711_p8, %p1710_p1 }
 0x1e7   : > { %1236 = dma.done.wait (!%p1014_p9), %s826_s4, 256  }
 0x1e8   : > { %1238 = vsyncadd (!%p1014_p9), %s826_s4, 4294967040  ;;  %s22_s17 = sadd.s32 1, %s1261_s17   ;;  %s1712_s11 = sld [smem:[#allocation13_spill]] }
 0x1e9   : > { %p19_p6 = scmp.ge.s32.totalorder %s22_s17, 4   ;;  %s1713_s14 = sld [smem:[#allocation15_spill]] }
 0x1ea   : > { %s1714_s25 = sld [smem:[#allocation14_spill]]  ;;  %s1715_s12 = smov %s1245_s13 }
 0x1eb   : > { %s1717_s15 = smov %s1257_s16  ;;  %21 = sbr.rel (!%p19_p6) target bundleno = 11 (0xb), region = 116 }
 0x1ee   : > { %s1716_s13 = smov %s1712_s11 }
 0x1f0   : > { %s1718_s16 = smov %s1714_s25 }
 0x1f2   :  { %831 = vsyncpa [#allocation4], 1 }
 0x1f3   :  { %833 = vsyncpa [#allocation4 + $0x1], 1 }
 0x1f4   :  { %834 = vsyncpa [#allocation7], 1 }
 0x1f5   :  { %836 = vsyncpa [#allocation7 + $0x1], 1 }
 0x1f6   :  { %837 = vsyncpa [#allocation5], 1 }
 0x1f7   :  { %839 = vsyncpa [#allocation5 + $0x1], 1 }

</bundles_post_ra>
